<compile_context>
chip_gen: v7x
topology: tpu7x:2x2x1
jax: 0.10.0
libtpu: 0.0.40
codegen_flags: <defaults>
</compile_context>

<pallas_src>
import functools
import math

import jax
import jax.numpy as jnp
from jax import lax
from jax.experimental import pallas as pl
from jax.experimental.pallas import tpu as pltpu

_GELU_C = math.sqrt(2.0 / math.pi)
_LN_EPS = 1e-5
_COMPUTE_DTYPE = jnp.bfloat16          # MXU feed dtype; accumulation stays f32


# --------------------- generation-aware sizing ------------------------------

def _detect_vmem_bytes():
    """Physical VMEM per core; conservative 64 MiB (v7x-sized) fallback if query fails."""
    try:
        info = pltpu.get_tpu_info()
        for attr in ("vmem_capacity_bytes", "vmem_size_bytes", "vmem_bytes"):
            v = getattr(info, attr, None)
            if v:
                return int(v)
    except Exception:
        pass
    return 64 * 1024 * 1024


_VMEM_PHYS = _detect_vmem_bytes()
# ~75% of physical VMEM, capped at 96 MiB (v5e/v6e -> 96 MiB, v7x (64 MiB phys) -> 48 MiB).
_VMEM_LIMIT = max(32 * 1024 * 1024, min(96 * 1024 * 1024, (_VMEM_PHYS * 3) // 4))
# Bigger row tiles cut weight re-streaming (weight HBM traffic scales with M/tm).
_ROW_TILE = 512 if _VMEM_PHYS >= 100 * 1024 * 1024 else 256
_LANE_TILE = 512        # output-lane tile (multiple of 128; trailing partial blocks are fine)
_Q_TILE = 512           # attention query tile target (amortizes KV re-reads)
_KV_TILE = 512          # attention KV (reduction) tile target


def _row_tile(m):
    return min(_ROW_TILE, m)


def _lane_tile(n):
    # Output-lane axes need not divide exactly; _LANE_TILE is a multiple of 128.
    return min(_LANE_TILE, n)


def _divisor_tile(n, target):
    """Largest 128-aligned divisor of n <= target (reduction tiles must divide exactly or
    padded garbage would corrupt the accumulator).  Falls back to the full axis."""
    if n <= target:
        return n
    d = (target // 128) * 128
    while d >= 128:
        if n % d == 0:
            return d
        d -= 128
    return n


def _head_group(num_heads, head_dim):
    """Heads folded into one attention block: the smallest group whose lane width (g*D) is
    128-aligned; otherwise all heads (block width == full H*D)."""
    for g in range(1, num_heads + 1):
        if num_heads % g == 0 and (g * head_dim) % 128 == 0:
            return g
    return num_heads


# ------------------------------ math helpers --------------------------------

def _ln_f32(x, g, b):
    mean = jnp.mean(x, axis=-1, keepdims=True)
    var = jnp.mean(jnp.square(x - mean), axis=-1, keepdims=True)
    return (x - mean) * lax.rsqrt(var + _LN_EPS) * g + b


def _gelu_tanh(x):
    return 0.5 * x * (1.0 + jnp.tanh(_GELU_C * (x + 0.044715 * (x * x * x))))


# ------------------------------ kernel bodies -------------------------------

def _ln_qkv_kernel(x_ref, g_ref, b_ref, w_ref, bias_ref, o_ref, lnx_sc):
    """LayerNorm(x) computed once per row tile (cached in VMEM), then one lane tile of the
    fused (E, 3*HD) QKV projection."""
    @pl.when(pl.program_id(1) == 0)            # lane axis is "arbitrary" -> sequential per row tile
    def _():
        x = x_ref[...].astype(jnp.float32)
        lnx_sc[...] = _ln_f32(x, g_ref[...], b_ref[...]).astype(_COMPUTE_DTYPE)

    y = jnp.dot(lnx_sc[...], w_ref[...], preferred_element_type=jnp.float32)
    o_ref[...] = (y + bias_ref[...]).astype(o_ref.dtype)


def _flash_attn_body(q_ref, k_ref, v_ref, mask_ref, o_ref, m_sc, l_sc, acc_sc,
                     *, heads_per_block, head_dim, scale):
    """Online-softmax attention over the KV grid axis for one (batch, head-group, q-tile)."""
    D = head_dim
    ki = pl.program_id(3)

    @pl.when(ki == 0)
    def _init():
        m_sc[...] = jnp.full(m_sc.shape, -jnp.inf, m_sc.dtype)
        l_sc[...] = jnp.zeros(l_sc.shape, l_sc.dtype)
        acc_sc[...] = jnp.zeros(acc_sc.shape, acc_sc.dtype)

    mask = None if mask_ref is None else mask_ref[0]           # (tq, tk), additive, f32

    for h in range(heads_per_block):                           # 1 or 2 heads on aligned shapes
        sl = pl.ds(h * D, D)
        qh = q_ref[0, :, sl].astype(_COMPUTE_DTYPE)            # (tq, D)
        kh = k_ref[0, :, sl].astype(_COMPUTE_DTYPE)            # (tk, D)
        vh = v_ref[0, :, sl].astype(_COMPUTE_DTYPE)            # (tk, D)
        # contract last dims directly -> no k transpose materialized
        s = lax.dot_general(qh, kh, (((1,), (1,)), ((), ())),
                            preferred_element_type=jnp.float32) * scale
        if mask is not None:
            s = s + mask
        m_prev = m_sc[h]                                       # (tq, 1)
        m_new = jnp.maximum(m_prev, jnp.max(s, axis=-1, keepdims=True))
        alpha = jnp.exp(m_prev - m_new)
        p = jnp.exp(s - m_new)                                 # (tq, tk)
        l_sc[h] = alpha * l_sc[h] + jnp.sum(p, axis=-1, keepdims=True)
        acc_sc[:, sl] = alpha * acc_sc[:, sl] + lax.dot_general(
            p.astype(_COMPUTE_DTYPE), vh, (((1,), (0,)), ((), ())),
            preferred_element_type=jnp.float32)
        m_sc[h] = m_new

    @pl.when(ki == pl.num_programs(3) - 1)
    def _finalize():
        tq = acc_sc.shape[0]
        if heads_per_block == 1:
            out = acc_sc[...] * pl.reciprocal(l_sc[0], approx=True)
        else:
            inv = jnp.concatenate(
                [jnp.broadcast_to(pl.reciprocal(l_sc[h], approx=True), (tq, D))
                 for h in range(heads_per_block)], axis=-1)
            out = acc_sc[...] * inv
        o_ref[0] = out.astype(o_ref.dtype)                     # single lane-dense store
    # TODO(synk): fusing the output projection + residual into this finalize would remove a
    # full (B*S, HD) HBM round trip; needs a resident Wo tile (check v7x 64 MiB budget).


def _attn_kernel_nomask(q_ref, k_ref, v_ref, o_ref, m_sc, l_sc, acc_sc, **kw):
    _flash_attn_body(q_ref, k_ref, v_ref, None, o_ref, m_sc, l_sc, acc_sc, **kw)


def _attn_kernel_masked(q_ref, k_ref, v_ref, mask_ref, o_ref, m_sc, l_sc, acc_sc, **kw):
    _flash_attn_body(q_ref, k_ref, v_ref, mask_ref, o_ref, m_sc, l_sc, acc_sc, **kw)


def _linear_residual_kernel(x_ref, w_ref, b_ref, res_ref, o_ref):
    """o = x @ W + b + res (attention output projection fused with the first residual add)."""
    y = jnp.dot(x_ref[...].astype(_COMPUTE_DTYPE), w_ref[...],
                preferred_element_type=jnp.float32)
    o_ref[...] = (y + b_ref[...] + res_ref[...].astype(jnp.float32)).astype(o_ref.dtype)


def _ln_ffn_residual_kernel(h_ref, g_ref, b_ref, w1_ref, b1_ref, w2_ref, b2_ref,
                            o_ref, lnx_sc, acc_sc):
    """o = GELU_tanh(LN(h) @ W1 + b1) @ W2 + b2 + h, with W1/W2 streamed in F-tiles."""
    f = pl.program_id(1)

    @pl.when(f == 0)
    def _init():
        h = h_ref[...].astype(jnp.float32)
        lnx_sc[...] = _ln_f32(h, g_ref[...], b_ref[...]).astype(_COMPUTE_DTYPE)
        acc_sc[...] = jnp.zeros(acc_sc.shape, acc_sc.dtype)

    mid = jnp.dot(lnx_sc[...], w1_ref[...], preferred_element_type=jnp.float32) + b1_ref[...]
    mid = _gelu_tanh(mid)
    acc_sc[...] += jnp.dot(mid.astype(_COMPUTE_DTYPE), w2_ref[...],
                           preferred_element_type=jnp.float32)

    @pl.when(f == pl.num_programs(1) - 1)
    def _finalize():
        o_ref[...] = (acc_sc[...] + b2_ref[...] + h_ref[...].astype(jnp.float32)
                      ).astype(o_ref.dtype)


# -------------------------------- wrappers ----------------------------------

def ln_qkv_fused(x2d, g, b, wqkv, bqkv):
    M, E = x2d.shape
    N = wqkv.shape[1]                          # 3 * H * D
    tm, tn = _row_tile(M), _lane_tile(N)
    grid = (pl.cdiv(M, tm), pl.cdiv(N, tn))
    cost = pl.CostEstimate(
        flops=int(2 * M * E * N + 10 * M * E), transcendentals=0,
        bytes_accessed=int(4 * M * E + 2 * E * N + 2 * M * N))
    return pl.pallas_call(
        _ln_qkv_kernel,
        out_shape=jax.ShapeDtypeStruct((M, N), _COMPUTE_DTYPE),
        grid=grid,
        in_specs=[pl.BlockSpec((tm, E), lambda i, j: (i, 0)),
                  pl.BlockSpec((1, E), lambda i, j: (0, 0)),
                  pl.BlockSpec((1, E), lambda i, j: (0, 0)),
                  pl.BlockSpec((E, tn), lambda i, j: (0, j)),
                  pl.BlockSpec((1, tn), lambda i, j: (0, j))],
        out_specs=pl.BlockSpec((tm, tn), lambda i, j: (i, j)),
        scratch_shapes=[pltpu.VMEM((tm, E), _COMPUTE_DTYPE)],       # LN1(x) cache
        compiler_params=pltpu.CompilerParams(
            dimension_semantics=("parallel", "arbitrary"),          # lane axis sequential
            vmem_limit_bytes=_VMEM_LIMIT),
        cost_estimate=cost,
    )(x2d, g.reshape(1, E), b.reshape(1, E), wqkv, bqkv.reshape(1, N))


def flash_attention(qkv3, mask, *, num_heads, head_dim):
    """qkv3: (B, S, 3*H*D) fused projection (q | k | v on the last axis), bf16.
    mask: None, or (1 or B, S, S) additive f32 — kept broadcast, never tiled out to B."""
    B, S, _ = qkv3.shape
    H, D = num_heads, head_dim
    HD = H * D
    g = _head_group(H, D)                      # heads folded per block
    gd = g * D
    n_hg = H // g                              # head-group grid extent
    scale = 1.0 / math.sqrt(D)
    tq = _divisor_tile(S, _Q_TILE)
    tk = _divisor_tile(S, _KV_TILE)            # reduction tile must divide S
    grid = (B, n_hg, S // tq, S // tk)

    if gd % 128 == 0:
        # Lane-aligned head groups: read q/k/v straight from the fused projection via
        # last-axis block offsets (no XLA split, no head transposes).
        q_arr = k_arr = v_arr = qkv3
        q_spec = pl.BlockSpec((1, tq, gd), lambda bi, h, qi, ki: (bi, qi, h))
        k_spec = pl.BlockSpec((1, tk, gd), lambda bi, h, qi, ki: (bi, ki, n_hg + h))
        v_spec = pl.BlockSpec((1, tk, gd), lambda bi, h, qi, ki: (bi, ki, 2 * n_hg + h))
    else:
        # Unaligned (tiny) head widths: one group spanning all heads; split q/k/v outside
        # so blocks cover the full last axis (cheap at these sizes).
        q_arr = qkv3[:, :, :HD]
        k_arr = qkv3[:, :, HD:2 * HD]
        v_arr = qkv3[:, :, 2 * HD:]
        q_spec = pl.BlockSpec((1, tq, gd), lambda bi, h, qi, ki: (bi, qi, 0))
        k_spec = pl.BlockSpec((1, tk, gd), lambda bi, h, qi, ki: (bi, ki, 0))
        v_spec = pl.BlockSpec((1, tk, gd), lambda bi, h, qi, ki: (bi, ki, 0))

    out_spec = pl.BlockSpec((1, tq, gd), lambda bi, h, qi, ki: (bi, qi, h))
    scratch = [pltpu.VMEM((g, tq, 1), jnp.float32),      # running max m
               pltpu.VMEM((g, tq, 1), jnp.float32),      # running denom l
               pltpu.VMEM((tq, gd), jnp.float32)]        # lane-dense f32 accumulator

    cost = pl.CostEstimate(
        flops=int(4 * B * H * S * S * D), transcendentals=int(B * H * S * S),
        bytes_accessed=int(2 * 4 * B * S * HD
                           + (0 if mask is None else 4 * int(mask.shape[0]) * S * S * n_hg)))

    if mask is None:
        kernel = functools.partial(_attn_kernel_nomask,
                                   heads_per_block=g, head_dim=D, scale=scale)
        in_specs = [q_spec, k_spec, v_spec]
        args = (q_arr, k_arr, v_arr)
    else:
        mb = int(mask.shape[0])
        mask_spec = pl.BlockSpec(
            (1, tq, tk),
            (lambda bi, h, qi, ki: (bi, qi, ki)) if mb == B
            else (lambda bi, h, qi, ki: (0, qi, ki)))
        kernel = functools.partial(_attn_kernel_masked,
                                   heads_per_block=g, head_dim=D, scale=scale)
        in_specs = [q_spec, k_spec, v_spec, mask_spec]
        args = (q_arr, k_arr, v_arr, mask)

    return pl.pallas_call(
        kernel,
        out_shape=jax.ShapeDtypeStruct((B, S, HD), _COMPUTE_DTYPE),
        grid=grid,
        in_specs=in_specs,
        out_specs=out_spec,
        scratch_shapes=scratch,
        compiler_params=pltpu.CompilerParams(
            dimension_semantics=("parallel", "parallel", "parallel", "arbitrary"),
            vmem_limit_bytes=_VMEM_LIMIT),
        cost_estimate=cost,
    )(*args)


def linear_residual(x, w, b, res):
    M, K = x.shape
    N = w.shape[1]
    tm, tn = _row_tile(M), _lane_tile(N)
    grid = (pl.cdiv(M, tm), pl.cdiv(N, tn))
    cost = pl.CostEstimate(
        flops=int(2 * M * K * N), transcendentals=0,
        bytes_accessed=int(2 * M * K + 2 * K * N + 2 * 4 * M * N))
    # TODO(synk): on v5e a bf16 residual stream (res/out) would ~halve activation HBM traffic;
    # kept f32 here to preserve accuracy of the reference comparison.
    return pl.pallas_call(
        _linear_residual_kernel,
        out_shape=jax.ShapeDtypeStruct((M, N), res.dtype),
        grid=grid,
        in_specs=[pl.BlockSpec((tm, K), lambda i, j: (i, 0)),
                  pl.BlockSpec((K, tn), lambda i, j: (0, j)),
                  pl.BlockSpec((1, tn), lambda i, j: (0, j)),
                  pl.BlockSpec((tm, tn), lambda i, j: (i, j))],
        out_specs=pl.BlockSpec((tm, tn), lambda i, j: (i, j)),
        compiler_params=pltpu.CompilerParams(
            dimension_semantics=("parallel", "parallel"),
            vmem_limit_bytes=_VMEM_LIMIT),
        cost_estimate=cost,
    )(x, w, b.reshape(1, N), res)


def ln_ffn_residual(h, g, b, w1, b1, w2, b2):
    M, E = h.shape
    F = w1.shape[1]
    tm = _row_tile(M)
    tf = _divisor_tile(F, _LANE_TILE)          # reduction tile must divide F
    grid = (pl.cdiv(M, tm), F // tf)
    cost = pl.CostEstimate(
        flops=int(4 * M * E * F), transcendentals=int(M * F),
        bytes_accessed=int(2 * 4 * M * E + 2 * 2 * E * F + 4 * (F + E)))
    return pl.pallas_call(
        _ln_ffn_residual_kernel,
        out_shape=jax.ShapeDtypeStruct((M, E), h.dtype),
        grid=grid,
        in_specs=[pl.BlockSpec((tm, E), lambda i, f: (i, 0)),
                  pl.BlockSpec((1, E), lambda i, f: (0, 0)),
                  pl.BlockSpec((1, E), lambda i, f: (0, 0)),
                  pl.BlockSpec((E, tf), lambda i, f: (0, f)),
                  pl.BlockSpec((1, tf), lambda i, f: (0, f)),
                  pl.BlockSpec((tf, E), lambda i, f: (f, 0)),
                  pl.BlockSpec((1, E), lambda i, f: (0, 0))],
        out_specs=pl.BlockSpec((tm, E), lambda i, f: (i, 0)),
        scratch_shapes=[pltpu.VMEM((tm, E), _COMPUTE_DTYPE),     # LN2(h) cache
                        pltpu.VMEM((tm, E), jnp.float32)],       # f32 accumulator
        compiler_params=pltpu.CompilerParams(
            dimension_semantics=("parallel", "arbitrary"),
            vmem_limit_bytes=_VMEM_LIMIT),
        cost_estimate=cost,
    )(h, g.reshape(1, E), b.reshape(1, E), w1, b1.reshape(1, F), w2, b2.reshape(1, E))


# ------------------------ decoder block forward ------------------------------

def _prepare_mask(attention_mask, B, S):
    """Normalize to (1 or B, S, S) additive f32 without materializing the batch broadcast."""
    if attention_mask is None:
        return None
    m = jnp.asarray(attention_mask, jnp.float32)
    if m.ndim == 4:
        if m.shape[1] != 1:
            # TODO(synk): per-head additive masks (e.g. ALiBi) are not supported by this kernel.
            raise NotImplementedError("per-head 4-D attention masks are not supported")
        m = m[:, 0]
    elif m.ndim == 2:
        m = m[None]
    if m.ndim != 3 or m.shape[-2:] != (S, S):
        raise ValueError(f"attention_mask must broadcast as (batch, S, S); got shape "
                         f"{tuple(jnp.shape(attention_mask))}")
    if m.shape[0] not in (1, B):
        raise ValueError("attention_mask batch dim must be 1 or B")
    return m


def transformer_decoder_block(inputs, params, attention_mask=None):
    B, S, E = inputs.shape
    H, D = params["num_heads"], params["head_dim"]
    HD = H * D
    x2d = inputs.reshape(B * S, E)

    # Weights feed the MXU in bf16 (halves weight HBM traffic; accumulation is f32).
    wqkv = jnp.concatenate([params["wq"], params["wk"], params["wv"]],
                           axis=1).astype(_COMPUTE_DTYPE)          # (E, 3*HD)
    bqkv = jnp.concatenate([params["bq"], params["bk"], params["bv"]])
    wo = params["wo"].astype(_COMPUTE_DTYPE)
    w1 = params["w1"].astype(_COMPUTE_DTYPE)
    w2 = params["w2"].astype(_COMPUTE_DTYPE)

    # --- kernel 1: LN1 + fused QKV projection --------------------------------
    qkv = ln_qkv_fused(x2d, params["ln1_g"], params["ln1_b"], wqkv, bqkv)   # (M, 3*HD) bf16
    qkv3 = qkv.reshape(B, S, 3 * HD)

    # --- kernel 2: flash attention --------------------------------------------
    mask = _prepare_mask(attention_mask, B, S)
    attn = flash_attention(qkv3, mask, num_heads=H, head_dim=D)            # (B, S, HD) bf16
    attn2d = attn.reshape(B * S, HD)

    # --- kernel 3: output projection + residual 1 ------------------------------
    h = linear_residual(attn2d, wo, params["bo"], x2d)                     # (B*S, E) f32

    # --- kernel 4: LN2 + FFN (GELU-tanh) + residual 2 ---------------------------
    out = ln_ffn_residual(h, params["ln2_g"], params["ln2_b"],
                          w1, params["b1"], w2, params["b2"])              # (B*S, E) f32

    return out.reshape(B, S, E)
    # TODO(synk): output_attentions path (returning attention probabilities) is not wired
    # through the flash kernel (probabilities are never materialized).


# ------------------------------ parameter init -------------------------------

def init_params(key, embedding_dim, dim_feedforward, num_heads, head_dim):
    E, F, HD = embedding_dim, dim_feedforward, num_heads * head_dim
    ks = jax.random.split(key, 8)
    std = 0.02
    return dict(
        num_heads=num_heads, head_dim=head_dim,
        ln1_g=jnp.ones((E,), jnp.float32), ln1_b=jnp.zeros((E,), jnp.float32),
        ln2_g=jnp.ones((E,), jnp.float32), ln2_b=jnp.zeros((E,), jnp.float32),
        wq=std * jax.random.normal(ks[0], (E, HD), jnp.float32), bq=jnp.zeros((HD,), jnp.float32),
        wk=std * jax.random.normal(ks[1], (E, HD), jnp.float32), bk=jnp.zeros((HD,), jnp.float32),
        wv=std * jax.random.normal(ks[2], (E, HD), jnp.float32), bv=jnp.zeros((HD,), jnp.float32),
        wo=std * jax.random.normal(ks[3], (HD, E), jnp.float32), bo=jnp.zeros((E,), jnp.float32),
        w1=std * jax.random.normal(ks[4], (E, F), jnp.float32),
        b1=0.01 * jax.random.normal(ks[5], (F,), jnp.float32),
        w2=std * jax.random.normal(ks[6], (F, E), jnp.float32),
        b2=0.01 * jax.random.normal(ks[7], (E,), jnp.float32),
    )


# ------------------------------ pure-JAX reference ----------------------------

def reference(inputs, p, attention_mask=None):
    B, S, E = inputs.shape
    H, D = p["num_heads"], p["head_dim"]

    def ln(x, g, b):
        m = x.mean(-1, keepdims=True)
        v = ((x - m) ** 2).mean(-1, keepdims=True)
        return (x - m) / jnp.sqrt(v + _LN_EPS) * g + b

    x = inputs
    y = ln(x, p["ln1_g"], p["ln1_b"])
    q = (y @ p["wq"] + p["bq"]).reshape(B, S, H, D).transpose(0, 2, 1, 3)
    k = (y @ p["wk"] + p["bk"]).reshape(B, S, H, D).transpose(0, 2, 1, 3)
    v = (y @ p["wv"] + p["bv"]).reshape(B, S, H, D).transpose(0, 2, 1, 3)
    s = jnp.einsum("bhqd,bhkd->bhqk", q, k) / math.sqrt(D)
    if attention_mask is not None:
        s = s + jnp.asarray(attention_mask, jnp.float32)
    a = jax.nn.softmax(s, axis=-1)
    o = jnp.einsum("bhqk,bhkd->bhqd", a, v).transpose(0, 2, 1, 3).reshape(B, S, H * D)
    mha = o @ p["wo"] + p["bo"]
    h = mha + x
    z = ln(h, p["ln2_g"], p["ln2_b"])
    hh = z @ p["w1"] + p["b1"]
    hh = 0.5 * hh * (1.0 + jnp.tanh(_GELU_C * (hh + 0.044715 * hh ** 3)))
    return hh @ p["w2"] + p["b2"] + h


# ----------------------------------- main -------------------------------------

if __name__ == "__main__":
    def run_case(name, B, S, E, F, H, D, use_mask):
        key = jax.random.PRNGKey(0)
        k_x, k_p = jax.random.split(key)
        x = jax.random.normal(k_x, (B, S, E), jnp.float32)
        p = init_params(k_p, E, F, H, D)
        mask = None
        if use_mask:
            causal = jnp.where(jnp.tril(jnp.ones((S, S), bool)), 0.0, -1e9).astype(jnp.float32)
            mask = causal[None, None]          # (1, 1, S, S) -> stays (1, S, S) inside
        out = jax.block_until_ready(transformer_decoder_block(x, p, mask))
        ref = reference(x, p, mask)
        assert out.shape == (B, S, E)
        err = float(jnp.max(jnp.abs(out - ref)))
        assert err < 2e-2, f"{name}: max abs err {err} vs reference"

    # tiny shapes (unaligned head width -> in-kernel head unroll / wrapper-split path)
    run_case("small-nomask", B=2, S=8, E=32, F=64, H=2, D=16, use_mask=False)
    run_case("small-causal", B=2, S=8, E=32, F=64, H=2, D=16, use_mask=True)
    # lane-aligned heads (2 heads per 128-lane block, offset BlockSpecs into fused QKV)
    run_case("aligned-nomask", B=2, S=128, E=64, F=256, H=4, D=64, use_mask=False)
    run_case("aligned-causal", B=2, S=128, E=64, F=256, H=4, D=64, use_mask=True)

    print("KERNEL_OK")
</pallas_src>

<mosaic_0001>
module attributes {stable_mosaic.version = 11 : i64} {
  func.func @_ln_qkv_kernel(%arg0: i32, %arg1: i32, %arg2: memref<16x32xf32, #tpu.memory_space<vmem>>, %arg3: memref<1x32xf32, #tpu.memory_space<vmem>>, %arg4: memref<1x32xf32, #tpu.memory_space<vmem>>, %arg5: memref<32x96xbf16, #tpu.memory_space<vmem>>, %arg6: memref<1x96xf32, #tpu.memory_space<vmem>>, %arg7: memref<16x96xbf16, #tpu.memory_space<vmem>>, %arg8: memref<16x32xbf16, #tpu.memory_space<vmem>>) attributes {dimension_semantics = [#tpu.dimension_semantics<parallel>, #tpu.dimension_semantics<arbitrary>], iteration_bounds = array<i64: 1, 1>, scalar_prefetch = 0 : i64, scratch_operands = 1 : i64, tpu.core_type = #tpu.core_type<tc>, window_params = [{transform_indices = @transform_0, window_bounds = array<i64: 16, 32>}, {pipeline_mode = #tpu.pipeline_mode<synchronous>, transform_indices = @transform_1, window_bounds = array<i64: 1, 32>}, {pipeline_mode = #tpu.pipeline_mode<synchronous>, transform_indices = @transform_2, window_bounds = array<i64: 1, 32>}, {transform_indices = @transform_3, window_bounds = array<i64: 32, 96>}, {transform_indices = @transform_4, window_bounds = array<i64: 1, 96>}, {transform_indices = @transform_5, window_bounds = array<i64: 16, 96>}]} {
    %c0_i32 = arith.constant 0 : i32
    %0 = arith.cmpi eq, %arg1, %c0_i32 : i32
    %1 = arith.extui %0 : i1 to i32
    %c0_i32_0 = arith.constant 0 : i32
    %2 = arith.cmpi ne, %1, %c0_i32_0 : i32
    scf.if %2 {
      %c0_8 = arith.constant 0 : index
      %c0_9 = arith.constant 0 : index
      %11 = vector.load %arg2[%c0_8, %c0_9] : memref<16x32xf32, #tpu.memory_space<vmem>>, vector<16x32xf32>
      %c0_10 = arith.constant 0 : index
      %c0_11 = arith.constant 0 : index
      %12 = vector.load %arg3[%c0_10, %c0_11] : memref<1x32xf32, #tpu.memory_space<vmem>>, vector<1x32xf32>
      %c0_12 = arith.constant 0 : index
      %c0_13 = arith.constant 0 : index
      %13 = vector.load %arg4[%c0_12, %c0_13] : memref<1x32xf32, #tpu.memory_space<vmem>>, vector<1x32xf32>
      %cst_14 = arith.constant dense<0.000000e+00> : vector<16xf32>
      %14 = vector.multi_reduction <add>, %11, %cst_14 [1] : vector<16x32xf32> to vector<16xf32>
      %15 = vector.shape_cast %14 : vector<16xf32> to vector<16x1xf32>
      %cst_15 = arith.constant 3.200000e+01 : f32
      %16 = vector.broadcast %cst_15 : f32 to vector<16x1xf32>
      %17 = arith.divf %15, %16 : vector<16x1xf32>
      %18 = vector.broadcast %17 : vector<16x1xf32> to vector<16x32xf32>
      %19 = arith.subf %11, %18 : vector<16x32xf32>
      %20 = arith.mulf %19, %19 : vector<16x32xf32>
      %cst_16 = arith.constant dense<0.000000e+00> : vector<16xf32>
      %21 = vector.multi_reduction <add>, %20, %cst_16 [1] : vector<16x32xf32> to vector<16xf32>
      %22 = vector.shape_cast %21 : vector<16xf32> to vector<16x1xf32>
      %cst_17 = arith.constant 3.200000e+01 : f32
      %23 = vector.broadcast %cst_17 : f32 to vector<16x1xf32>
      %24 = arith.divf %22, %23 : vector<16x1xf32>
      %25 = vector.broadcast %17 : vector<16x1xf32> to vector<16x32xf32>
      %26 = arith.subf %11, %25 : vector<16x32xf32>
      %cst_18 = arith.constant 9.99999974E-6 : f32
      %27 = vector.broadcast %cst_18 : f32 to vector<16x1xf32>
      %28 = arith.addf %24, %27 : vector<16x1xf32>
      %29 = math.rsqrt %28 : vector<16x1xf32>
      %30 = vector.broadcast %29 : vector<16x1xf32> to vector<16x32xf32>
      %31 = arith.mulf %26, %30 : vector<16x32xf32>
      %32 = vector.broadcast %12 : vector<1x32xf32> to vector<16x32xf32>
      %33 = arith.mulf %31, %32 : vector<16x32xf32>
      %34 = vector.broadcast %13 : vector<1x32xf32> to vector<16x32xf32>
      %35 = arith.addf %33, %34 : vector<16x32xf32>
      %36 = arith.truncf %35 : vector<16x32xf32> to vector<16x32xbf16>
      %c0_19 = arith.constant 0 : index
      %c0_20 = arith.constant 0 : index
      %37 = vector.load %arg8[%c0_19, %c0_20] : memref<16x32xbf16, #tpu.memory_space<vmem>>, vector<16x32xbf16>
      tpu.vector_store %arg8[%c0_19, %c0_20], %36 {strides = array<i32>} : memref<16x32xbf16, #tpu.memory_space<vmem>>, vector<16x32xbf16>,
    } else {
    }
    %c0 = arith.constant 0 : index
    %c0_1 = arith.constant 0 : index
    %3 = vector.load %arg8[%c0, %c0_1] : memref<16x32xbf16, #tpu.memory_space<vmem>>, vector<16x32xbf16>
    %c0_2 = arith.constant 0 : index
    %c0_3 = arith.constant 0 : index
    %4 = vector.load %arg5[%c0_2, %c0_3] : memref<32x96xbf16, #tpu.memory_space<vmem>>, vector<32x96xbf16>
    %cst = arith.constant dense<0.000000e+00> : vector<16x96xf32>
    %5 = tpu.matmul %3, %4, %cst {dimension_numbers = #tpu.dot_dimension_numbers<[1], [0], [0], [1], [0, 0, 1, 1], [], []>} : vector<16x32xbf16>, vector<32x96xbf16>, vector<16x96xf32> -> vector<16x96xf32>
    %c0_4 = arith.constant 0 : index
    %c0_5 = arith.constant 0 : index
    %6 = vector.load %arg6[%c0_4, %c0_5] : memref<1x96xf32, #tpu.memory_space<vmem>>, vector<1x96xf32>
    %7 = vector.broadcast %6 : vector<1x96xf32> to vector<16x96xf32>
    %8 = arith.addf %5, %7 : vector<16x96xf32>
    %9 = arith.truncf %8 : vector<16x96xf32> to vector<16x96xbf16>
    %c0_6 = arith.constant 0 : index
    %c0_7 = arith.constant 0 : index
    %10 = vector.load %arg7[%c0_6, %c0_7] : memref<16x96xbf16, #tpu.memory_space<vmem>>, vector<16x96xbf16>
    tpu.vector_store %arg7[%c0_6, %c0_7], %9 {strides = array<i32>} : memref<16x96xbf16, #tpu.memory_space<vmem>>, vector<16x96xbf16>,
    return
  }
  func.func @transform_0(%arg0: i32, %arg1: i32) -> (i32, i32) {
    %c0_i32 = arith.constant 0 : i32
    %c0_i32_0 = arith.constant 0 : i32
    return %arg0, %c0_i32 : i32, i32
  }
  func.func @transform_1(%arg0: i32, %arg1: i32) -> (i32, i32) {
    %c0_i32 = arith.constant 0 : i32
    %c0_i32_0 = arith.constant 0 : i32
    %c0_i32_1 = arith.constant 0 : i32
    return %c0_i32, %c0_i32_0 : i32, i32
  }
  func.func @transform_2(%arg0: i32, %arg1: i32) -> (i32, i32) {
    %c0_i32 = arith.constant 0 : i32
    %c0_i32_0 = arith.constant 0 : i32
    %c0_i32_1 = arith.constant 0 : i32
    return %c0_i32, %c0_i32_0 : i32, i32
  }
  func.func @transform_3(%arg0: i32, %arg1: i32) -> (i32, i32) {
    %c0_i32 = arith.constant 0 : i32
    %c0_i32_0 = arith.constant 0 : i32
    return %c0_i32, %arg1 : i32, i32
  }
  func.func @transform_4(%arg0: i32, %arg1: i32) -> (i32, i32) {
    %c0_i32 = arith.constant 0 : i32
    %c0_i32_0 = arith.constant 0 : i32
    return %c0_i32, %arg1 : i32, i32
  }
  func.func @transform_5(%arg0: i32, %arg1: i32) -> (i32, i32) {
    %c0_i32 = arith.constant 0 : i32
    return %arg0, %arg1 : i32, i32
  }
}

</mosaic_0001>

<bundles_post_ra>
// kernel: tpu_custom_call.1
= control target key start
LH: loop header
LB: loop body
LE: loop exit
PB: predicated region body
PF: predicated region fallthrough
CT: control target
= control target key end

     0   :  { %10 = vsyncpa [#allocation4], 0  ;;  %s406_s0 = inlined_call_operand.hbm [shape: f32[16,32], index: 0, kind: input, shape index: {}]   ;;  %s407_s1 = inlined_call_operand.vmem [shape: f32[1,32], index: 1, kind: input, shape index: {}]   ;;  %s408_s2 = inlined_call_operand.vmem [shape: f32[1,32], index: 2, kind: input, shape index: {}]   ;;  %s409_s3 = inlined_call_operand.hbm [shape: bf16[32,96], index: 3, kind: input, shape index: {}]   ;;  %s410_s4 = inlined_call_operand.vmem [shape: f32[1,96], index: 4, kind: input, shape index: {}]   ;;  %s411_s5 = inlined_call_operand.hbm [shape: bf16[16,96], index: 5, kind: output, shape index: {}]  }
   0x1   :  { %11 = vsyncpa [#allocation7], 0 }
   0x2   :  { %12 = vsyncpa [#allocation5], 0  ;;  %s310_s18 = smov [#allocation3]   ;;  %s238_s22 = scalar_lea.hbm %s406_s0, 256 }
   0x3   :  { %s18_s19 = sshll.u32 %s310_s18, 4  ;;  %p239_p0 = scmp.ne.s32.totalorder %s406_s0, %s238_s22  ;;  %s19_s19 = int_to_ptr.vmem [resolvable:$true] %s18_s19 }
   0x4   :  { %p242_p1 = scmp.lt.u32.totalorder %s238_s22, %s406_s0 }
   0x6   :  { %p244_p2 = pnand %p242_p1, %p239_p0 }
   0x8   :  { %247 = shalt.err (!%p244_p2)
}
   0x9   :  { %s248_s27 = scalar_lea.vmem %s19_s19, 256  ;;  %p253_p4 = scmp.lt.s32.totalorder %s19_s19, %s19_s19 }
   0xa   :  { %p249_p3 = scmp.ne.s32.totalorder %s19_s19, %s248_s27  ;;  %p254_p5 = scmp.lt.s32.totalorder %s248_s27, %s248_s27 }
   0xc   :  { %p255_p6 = por %p254_p5, %p253_p4 }
   0xe   :  { %p256_p7 = pnand %p255_p6, %p249_p3 }
  0x10   :  { %259 = shalt.err (!%p256_p7)
}
  0x11   :  { %s311_s28 = smov 128   ;;  %s312_s29 = smov 8  }
  0x12   :  { %24 = dma.hbm_to_vmem [thread:$0]  %s406_s0, 256, %s19_s19, [#allocation4], %s311_s28, %s311_s28, %s312_s29  }
  0x13   :  { %s313_s7 = smov [#allocation6]   ;;  %s260_s11 = scalar_lea.hbm %s409_s3, 256 }
  0x14   :  { %s34_s8 = sshll.u32 %s313_s7, 4  ;;  %p261_p8 = scmp.ne.s32.totalorder %s409_s3, %s260_s11  ;;  %s35_s8 = int_to_ptr.vmem [resolvable:$true] %s34_s8 }
  0x15   :  { %p264_p9 = scmp.lt.u32.totalorder %s260_s11, %s409_s3 }
  0x17   :  { %p266_p10 = pnand %p264_p9, %p261_p8 }
  0x19   :  { %269 = shalt.err (!%p266_p10)
}
  0x1a   :  { %s270_s16 = scalar_lea.vmem %s35_s8, 256  ;;  %p275_p12 = scmp.lt.s32.totalorder %s35_s8, %s35_s8 }
  0x1b   :  { %p271_p11 = scmp.ne.s32.totalorder %s35_s8, %s270_s16  ;;  %p276_p13 = scmp.lt.s32.totalorder %s270_s16, %s270_s16 }
  0x1d   :  { %p277_p0 = por %p276_p13, %p275_p12 }
  0x1f   :  { %p278_p1 = pnand %p277_p0, %p271_p11 }
  0x21   :  { %281 = shalt.err (!%p278_p1)
}
  0x22   :  { %s314_s0 = smov 64   ;;  %s315_s17 = smov 4  }
  0x23   :  { %40 = dma.hbm_to_vmem [thread:$0]  %s409_s3, 256, %s35_s8, [#allocation7], %s314_s0, %s314_s0, %s315_s17  }
  0x24   :  { %304 = dma.done.wait [#allocation4], 256  }
  0x25   :  { %305 = vsyncadd [#allocation4], 4294967040 }
  0x26   :  { %306 = dma.done.wait [#allocation7], 256  }
  0x27   :  { %307 = vsyncadd [#allocation7], 4294967040  ;;  %vm58_vm0 = vcmask 261120   ;;  %v54_v0 = vld [vmem:[#allocation3] sm:$0xff]  ;;  %v55_v1 = vld [vmem:[#allocation3 + $0x8] sm:$0xff]  ;;  %v316_v15 = vmov 0.0  }
  0x28   :  { %v59_v2 = vsel %vm58_vm0, %v54_v0, 0.0  ;;  %v62_v3 = vsel %vm58_vm0, %v55_v1, 0.0  ;;  %v232_v14 = vld [vmem:[#allocation6] sm:$0xff]   ;;  %215 = vmatprep.subr.bf16.mxu0 %v316_v15  ;;  %v233_v16 = vld [vmem:[#allocation6 + $0x8] sm:$0xff]   ;;  %vm317_vm1 = vmmov 0   ;;  %vm181_vm2 = vcmask 781312  }
  0x29   :  { %60 = vadd.xlane.f32.xlu0 %v59_v2  ;;  %216 = vmatpush3.bf16.msra.mxu0 %v232_v14  ;;  %v202_v25 = vld [vmem:[%s407_s1] ss:$0 sm:$0xff]  ;;  %s318_s1 = smov [#allocation8]  }
  0x2a   :  { %219 = vmatprep.mubr.msk.bf16.mxu0 %vm317_vm1, %v316_v15  ;;  %217 = vmatprep.subr.bf16.mxu0 %v316_v15  ;;  %v203_v29 = vld [vmem:[%s408_s2] ss:$0 sm:$0xff]  ;;  %s189_s2 = sshll.u32 %s318_s1, 4  ;;  %s190_s2 = int_to_ptr.vmem [resolvable:$true] %s189_s2 }
  0x2b   :  { %v204_v35 = vld [vmem:[%s410_s4] ss:$0 sm:$0xff]  ;;  %s282_s25 = scalar_lea.vmem %s190_s2, 128  ;;  %p287_p3 = scmp.lt.s32.totalorder %s190_s2, %s190_s2 }
  0x2c   :  { %p283_p2 = scmp.ne.s32.totalorder %s190_s2, %s282_s25  ;;  %p288_p4 = scmp.lt.s32.totalorder %s282_s25, %s282_s25 }
  0x2d   :  { %63 = vadd.xlane.f32.xlu0 %v62_v3  ;;  %218 = vmatpush3.bf16.msra.mxu0 %v233_v16 }
  0x2e   :  { %p289_p5 = por %p288_p4, %p287_p3 }
  0x30   :  { %p290_p6 = pnand %p289_p5, %p283_p2 }
  0xb6   :  { %v61_v4 = vpop.xlane.xlu0 %60 }
  0xb7   :  { %v66_v5 = vmul.f32 0.03125, %v61_v4 }
  0xb9   :  { %v68_v6 = vsub.f32 %v54_v0, %v66_v5 }
  0xba   :  { %v64_v7 = vpop.xlane.xlu0 %63 }
  0xbb   :  { %v67_v8 = vmul.f32 0.03125, %v64_v7  ;;  %v70_v9 = vmul.f32 %v68_v6, %v68_v6 }
  0xbd   :  { %v69_v10 = vsub.f32 %v55_v1, %v67_v8  ;;  %v72_v11 = vsel %vm58_vm0, %v70_v9, 0.0 }
  0xbe   :  { %73 = vadd.xlane.f32.xlu1 %v72_v11 }
  0xbf   :  { %v71_v12 = vmul.f32 %v69_v10, %v69_v10 }
  0xc1   :  { %v75_v13 = vsel %vm58_vm0, %v71_v12, 0.0 }
  0xc2   :  { %76 = vadd.xlane.f32.xlu1 %v75_v13 }
 0x14b   :  { %v74_v17 = vpop.xlane.xlu1 %73 }
 0x14c   :  { %v78_v18 = vmul.f32 0.03125, %v74_v17 }
 0x14e   :  { %v80_v19 = vadd.f32 1e-05, %v78_v18 }
 0x14f   :  { %v77_v20 = vpop.xlane.xlu1 %76 }
 0x150   :  { %234 = vrsqrt.f32 %v80_v19  ;;  %v79_v21 = vmul.f32 0.03125, %v77_v20 }
 0x152   :  { %v81_v22 = vadd.f32 1e-05, %v79_v21 }
 0x154   :  { %236 = vrsqrt.f32 %v81_v22 }
 0x15a   :  { %v235_v23 = vpop.eup %234 }
 0x15b   :  { %v84_v24 = vmul.f32 %v235_v23, %v68_v6 }
 0x15d   :  { %v92_v27 = vmul.f32 %v202_v25, %v84_v24 }
 0x15e   :  { %v237_v26 = vpop.eup %236 }
 0x15f   :  { %v85_v28 = vmul.f32 %v237_v26, %v69_v10  ;;  %v100_v31 = vadd.f32 %v203_v29, %v92_v27 }
 0x161   :  { %v93_v30 = vmul.f32 %v202_v25, %v85_v28 }
 0x163   :  { %v101_v32 = vadd.f32 %v203_v29, %v93_v30 }
 0x165   :  { %v102_v33 = vpack.c.bf16 %v101_v32, %v100_v31 }
 0x167   :  { %103 = vst.msk [vmem:[#allocation2] sm:$0xff] %vm58_vm0, %v102_v33 }
 0x16e   :  { %v104_v34 = vld [vmem:[#allocation2] sm:$0xff] }
 0x16f   :  { %220 = vmatmul.mubr.msk.bf16.vlgmr.msra.gmra.mrb[0].mxu0 %vm58_vm0, %v104_v34 }
 0x242   :  { %v166_v36 = vpop.f32.mrb[0].mxu0 }
 0x243   :  { %v167_v37 = vadd.f32 %v204_v35, %v166_v36  ;;  %v221_v38 = vpop.f32.mrb[1].mxu0 }
 0x244   :  { %v169_v39 = vpop.f32.mrb[2].mxu0 }
 0x245   :  { %v210_v40 = vpack.c.bf16 %v167_v37, %v167_v37  ;;  %v170_v41 = vadd.f32 %v204_v35, %v169_v39  ;;  %v222_v42 = vpop.f32.mrb[3].mxu0 }
 0x247   :  { %v211_v43 = vpack.c.bf16 %v170_v41, %v170_v41  ;;  %182 = vst.msk [vmem:[#allocation8] sm:$0xf] %vm181_vm2, %v210_v40 }
 0x249   :  { %183 = vst.msk [vmem:[#allocation8 + $0x4] sm:$0xf] %vm181_vm2, %v211_v43 }
 0x24a   :  { %293 = shalt.err (!%p290_p6)
}
 0x24b   :  { %s294_s27 = scalar_lea.hbm %s411_s5, 128 }
 0x24c   :  { %p295_p7 = scmp.ne.s32.totalorder %s411_s5, %s294_s27  ;;  %p298_p8 = scmp.lt.u32.totalorder %s294_s27, %s411_s5 }
 0x24e   :  { %p300_p9 = pnand %p298_p8, %p295_p7 }
 0x250   :  { %303 = shalt.err (!%p300_p9)
}
 0x251   :  { %195 = dma.vmem_to_hbm [thread:$0]  %s190_s2, 128, %s411_s5, [#allocation5], %s314_s0, %s314_s0, %s315_s17  }
 0x252   :  { %308 = dma.done.wait [#allocation5], 128  }
 0x253   :  { %309 = vsyncadd [#allocation5], 4294967168 }
 0x254   :  { %199 = vsyncpa [#allocation4], 1 }
 0x255   :  { %200 = vsyncpa [#allocation7], 1 }
 0x256   :  { %201 = vsyncpa [#allocation5], 1 }

</bundles_post_ra>
